<compile_context>
chip_gen: v5e
topology: v5e:2x2
jax: 0.10.0
libtpu: 0.0.40
codegen_flags: <defaults>
</compile_context>

<pallas_src>
import jax
import jax.numpy as jnp
from jax.experimental import pallas as pl
from jax.experimental.pallas import tpu as pltpu

S_PAD = 128  # one-hot contraction dim padded to one full lane width


def critic_kernel(obs_ref, slab_ref, out_ref):
    """obs_ref : SMEM (B,) int32 state ids (scalar-prefetched).
    slab_ref: VMEM (S_PAD + H + 3, H) packed f32 params:
        rows [0, S_PAD)        h1_table = relu(emb @ W1 + b1), zero-padded rows
        rows [S_PAD, S_PAD+H)  W2  (H, H)
        row  S_PAD + H         b2  (1, H)
        row  S_PAD + H + 1     W3^T (1, H)
        row  S_PAD + H + 2     b3 broadcast across the row (1, H)
    out_ref : VMEM (B, 1) f32 state values.
    """
    B = out_ref.shape[0]
    H = slab_ref.shape[1]

    # One-hot gather rows built directly from SMEM scalars (B is small/static).
    lane = jax.lax.broadcasted_iota(jnp.int32, (1, S_PAD), 1)
    rows = [(lane == obs_ref[i]).astype(jnp.float32) for i in range(B)]
    onehot = jnp.concatenate(rows, axis=0)                            # (B, S_PAD)

    # Embedding + Linear1 + ReLU folded into one MXU gather-matmul.
    h1_tab = slab_ref[0:S_PAD, :]                                     # (S_PAD, H)
    h1 = jnp.dot(onehot, h1_tab, preferred_element_type=jnp.float32)  # (B, H)

    # Linear2 + ReLU (MXU).
    w2 = slab_ref[S_PAD:S_PAD + H, :]                                 # (H, H)
    b2 = slab_ref[S_PAD + H:S_PAD + H + 1, :]                         # (1, H)
    h2 = jnp.maximum(
        jnp.dot(h1, w2, preferred_element_type=jnp.float32) + b2, 0.0)

    # Linear3 (N=1): VPU multiply + lane reduction, no MXU round-trip.
    w3_row = slab_ref[S_PAD + H + 1:S_PAD + H + 2, :]                 # (1, H)
    b3_row = slab_ref[S_PAD + H + 2:S_PAD + H + 3, :]                 # (1, H)
    v = jnp.sum(h2 * w3_row, axis=-1, keepdims=True) + b3_row[:, :1]  # (B, 1)
    out_ref[...] = v


def pack_params(params):
    """Fold Embedding+Linear1+ReLU into a table and pack everything into one
    contiguous f32 slab. Rebuild only when parameters change."""
    emb, w1, b1, w2, b2, w3, b3 = params
    max_states = emb.shape[0]
    H = w1.shape[1]
    assert max_states <= S_PAD, "pad size must cover max_states"
    h1_tab = jnp.maximum(emb @ w1 + b1, 0.0)                          # (S, H)
    h1_tab = jnp.zeros((S_PAD, H), jnp.float32).at[:max_states].set(h1_tab)
    w3_row = w3.reshape(1, H)                                         # (1, H)
    b3_row = jnp.broadcast_to(b3.reshape(1, 1), (1, H))               # (1, H)
    return jnp.concatenate([h1_tab, w2, b2, w3_row, b3_row], axis=0)  # (S_PAD+H+3, H)


def critic_forward(obs, slab):
    """obs: (B, 1) integer state indices; slab: output of pack_params.
    Returns (B, 1) float32 values (same semantics as Critic.forward)."""
    B = obs.shape[0]
    obs_flat = obs.reshape(B).astype(jnp.int32)
    grid_spec = pltpu.PrefetchScalarGridSpec(
        num_scalar_prefetch=1,               # obs -> SMEM, no VMEM DMA for it
        grid=(1,),
        in_specs=[pl.BlockSpec(slab.shape, lambda i, obs_s: (0, 0))],
        out_specs=pl.BlockSpec((B, 1), lambda i, obs_s: (0, 0)),
    )
    return pl.pallas_call(
        critic_kernel,
        out_shape=jax.ShapeDtypeStruct((B, 1), jnp.float32),
        grid_spec=grid_spec,
    )(obs_flat, slab)


def init_params(key, hidden_dim=32, max_states=100, embed_dim=1):
    """Deterministic init mimicking PyTorch defaults (Embedding ~ N(0,1),
    Linear ~ U(-1/sqrt(fan_in), 1/sqrt(fan_in))). Linear weights stored as
    (in, out), i.e. transposed vs PyTorch."""
    ks = jax.random.split(key, 7)

    def lin(kw, kb, fan_in, fan_out):
        bound = 1.0 / jnp.sqrt(jnp.float32(fan_in))
        w = jax.random.uniform(kw, (fan_in, fan_out), jnp.float32, -bound, bound)
        b = jax.random.uniform(kb, (1, fan_out), jnp.float32, -bound, bound)
        return w, b

    emb = jax.random.normal(ks[0], (max_states, embed_dim), jnp.float32)
    w1, b1 = lin(ks[1], ks[2], embed_dim, hidden_dim)
    w2, b2 = lin(ks[3], ks[4], hidden_dim, hidden_dim)
    w3, b3 = lin(ks[5], ks[6], hidden_dim, 1)
    return emb, w1, b1, w2, b2, w3, b3


def critic_ref(obs, params):
    """Pure-JAX reference (unfolded) for correctness checking."""
    emb, w1, b1, w2, b2, w3, b3 = params
    x = emb[obs[:, 0]]                              # (B, E)
    h1 = jnp.maximum(x @ w1 + b1, 0.0)
    h2 = jnp.maximum(h1 @ w2 + b2, 0.0)
    return h2 @ w3 + b3


if __name__ == "__main__":
    key = jax.random.PRNGKey(0)
    k_param, k_obs = jax.random.split(key)

    hidden_dim, max_states, embed_dim = 32, 100, 1
    batch = 8

    params = init_params(k_param, hidden_dim, max_states, embed_dim)
    obs = jax.random.randint(k_obs, (batch, 1), 0, max_states, dtype=jnp.int32)

    slab = pack_params(params)          # rebuild only when parameters change
    out = critic_forward(obs, slab)
    out = jax.block_until_ready(out)

    ref = critic_ref(obs, params)
    assert out.shape == (batch, 1)
    assert jnp.allclose(out, ref, atol=1e-5, rtol=1e-5), (out, ref)

    print("KERNEL_OK")
</pallas_src>

<mosaic_0001>
module attributes {stable_mosaic.version = 11 : i64} {
  func.func @critic_kernel(%arg0: i32, %arg1: memref<8xi32, #tpu.memory_space<smem>>, %arg2: memref<163x32xf32, #tpu.memory_space<vmem>>, %arg3: memref<8x1xf32, #tpu.memory_space<vmem>>) attributes {dimension_semantics = [#tpu.dimension_semantics<arbitrary>], iteration_bounds = array<i64: 1>, scalar_prefetch = 1 : i64, scratch_operands = 0 : i64, tpu.core_type = #tpu.core_type<tc>, window_params = [{pipeline_mode = #tpu.pipeline_mode<synchronous>, transform_indices = @transform_0, window_bounds = array<i64: 163, 32>}, {pipeline_mode = #tpu.pipeline_mode<synchronous>, transform_indices = @transform_1, window_bounds = array<i64: 8, 1>}]} {
    %0 = tpu.iota {dimensions = array<i32: 1>} : vector<1x128xi32>
    %c0 = arith.constant 0 : index
    %1 = memref.load %arg1[%c0] : memref<8xi32, #tpu.memory_space<smem>>
    %2 = vector.broadcast %1 : i32 to vector<1x128xi32>
    %3 = arith.cmpi eq, %0, %2 : vector<1x128xi32>
    %4 = arith.extui %3 : vector<1x128xi1> to vector<1x128xi32>
    %5 = arith.sitofp %4 : vector<1x128xi32> to vector<1x128xf32>
    %c1 = arith.constant 1 : index
    %6 = memref.load %arg1[%c1] : memref<8xi32, #tpu.memory_space<smem>>
    %7 = vector.broadcast %6 : i32 to vector<1x128xi32>
    %8 = arith.cmpi eq, %0, %7 : vector<1x128xi32>
    %9 = arith.extui %8 : vector<1x128xi1> to vector<1x128xi32>
    %10 = arith.sitofp %9 : vector<1x128xi32> to vector<1x128xf32>
    %c2 = arith.constant 2 : index
    %11 = memref.load %arg1[%c2] : memref<8xi32, #tpu.memory_space<smem>>
    %12 = vector.broadcast %11 : i32 to vector<1x128xi32>
    %13 = arith.cmpi eq, %0, %12 : vector<1x128xi32>
    %14 = arith.extui %13 : vector<1x128xi1> to vector<1x128xi32>
    %15 = arith.sitofp %14 : vector<1x128xi32> to vector<1x128xf32>
    %c3 = arith.constant 3 : index
    %16 = memref.load %arg1[%c3] : memref<8xi32, #tpu.memory_space<smem>>
    %17 = vector.broadcast %16 : i32 to vector<1x128xi32>
    %18 = arith.cmpi eq, %0, %17 : vector<1x128xi32>
    %19 = arith.extui %18 : vector<1x128xi1> to vector<1x128xi32>
    %20 = arith.sitofp %19 : vector<1x128xi32> to vector<1x128xf32>
    %c4 = arith.constant 4 : index
    %21 = memref.load %arg1[%c4] : memref<8xi32, #tpu.memory_space<smem>>
    %22 = vector.broadcast %21 : i32 to vector<1x128xi32>
    %23 = arith.cmpi eq, %0, %22 : vector<1x128xi32>
    %24 = arith.extui %23 : vector<1x128xi1> to vector<1x128xi32>
    %25 = arith.sitofp %24 : vector<1x128xi32> to vector<1x128xf32>
    %c5 = arith.constant 5 : index
    %26 = memref.load %arg1[%c5] : memref<8xi32, #tpu.memory_space<smem>>
    %27 = vector.broadcast %26 : i32 to vector<1x128xi32>
    %28 = arith.cmpi eq, %0, %27 : vector<1x128xi32>
    %29 = arith.extui %28 : vector<1x128xi1> to vector<1x128xi32>
    %30 = arith.sitofp %29 : vector<1x128xi32> to vector<1x128xf32>
    %c6 = arith.constant 6 : index
    %31 = memref.load %arg1[%c6] : memref<8xi32, #tpu.memory_space<smem>>
    %32 = vector.broadcast %31 : i32 to vector<1x128xi32>
    %33 = arith.cmpi eq, %0, %32 : vector<1x128xi32>
    %34 = arith.extui %33 : vector<1x128xi1> to vector<1x128xi32>
    %35 = arith.sitofp %34 : vector<1x128xi32> to vector<1x128xf32>
    %c7 = arith.constant 7 : index
    %36 = memref.load %arg1[%c7] : memref<8xi32, #tpu.memory_space<smem>>
    %37 = vector.broadcast %36 : i32 to vector<1x128xi32>
    %38 = arith.cmpi eq, %0, %37 : vector<1x128xi32>
    %39 = arith.extui %38 : vector<1x128xi1> to vector<1x128xi32>
    %40 = arith.sitofp %39 : vector<1x128xi32> to vector<1x128xf32>
    %41 = tpu.concatenate %5, %10, %15, %20, %25, %30, %35, %40 in 0 : vector<1x128xf32>, vector<1x128xf32>, vector<1x128xf32>, vector<1x128xf32>, vector<1x128xf32>, vector<1x128xf32>, vector<1x128xf32>, vector<1x128xf32> -> vector<8x128xf32>
    %c0_0 = arith.constant 0 : index
    %c0_1 = arith.constant 0 : index
    %42 = vector.load %arg2[%c0_0, %c0_1] : memref<163x32xf32, #tpu.memory_space<vmem>>, vector<128x32xf32>
    %cst = arith.constant dense<0.000000e+00> : vector<8x32xf32>
    %43 = tpu.matmul %41, %42, %cst {dimension_numbers = #tpu.dot_dimension_numbers<[1], [0], [0], [1], [0, 0, 1, 1], [], []>} : vector<8x128xf32>, vector<128x32xf32>, vector<8x32xf32> -> vector<8x32xf32>
    %c128 = arith.constant 128 : index
    %c0_2 = arith.constant 0 : index
    %44 = vector.load %arg2[%c128, %c0_2] : memref<163x32xf32, #tpu.memory_space<vmem>>, vector<32x32xf32>
    %c160 = arith.constant 160 : index
    %c0_3 = arith.constant 0 : index
    %45 = vector.load %arg2[%c160, %c0_3] : memref<163x32xf32, #tpu.memory_space<vmem>>, vector<1x32xf32>
    %cst_4 = arith.constant dense<0.000000e+00> : vector<8x32xf32>
    %46 = tpu.matmul %43, %44, %cst_4 {dimension_numbers = #tpu.dot_dimension_numbers<[1], [0], [0], [1], [0, 0, 1, 1], [], []>} : vector<8x32xf32>, vector<32x32xf32>, vector<8x32xf32> -> vector<8x32xf32>
    %47 = vector.broadcast %45 : vector<1x32xf32> to vector<8x32xf32>
    %48 = arith.addf %46, %47 : vector<8x32xf32>
    %cst_5 = arith.constant 0.000000e+00 : f32
    %49 = vector.broadcast %cst_5 : f32 to vector<8x32xf32>
    %50 = arith.maximumf %48, %49 : vector<8x32xf32>
    %c161 = arith.constant 161 : index
    %c0_6 = arith.constant 0 : index
    %51 = vector.load %arg2[%c161, %c0_6] : memref<163x32xf32, #tpu.memory_space<vmem>>, vector<1x32xf32>
    %c162 = arith.constant 162 : index
    %c0_7 = arith.constant 0 : index
    %52 = vector.load %arg2[%c162, %c0_7] : memref<163x32xf32, #tpu.memory_space<vmem>>, vector<1x32xf32>
    %53 = vector.broadcast %51 : vector<1x32xf32> to vector<8x32xf32>
    %54 = arith.mulf %50, %53 : vector<8x32xf32>
    %cst_8 = arith.constant dense<0.000000e+00> : vector<8xf32>
    %55 = vector.multi_reduction <add>, %54, %cst_8 [1] : vector<8x32xf32> to vector<8xf32>
    %56 = vector.shape_cast %55 : vector<8xf32> to vector<8x1xf32>
    %57 = vector.extract_strided_slice %52 {offsets = [0, 0], sizes = [1, 1], strides = [1, 1]} : vector<1x32xf32> to vector<1x1xf32>
    %58 = vector.broadcast %57 : vector<1x1xf32> to vector<8x1xf32>
    %59 = arith.addf %56, %58 : vector<8x1xf32>
    %c0_9 = arith.constant 0 : index
    %c0_10 = arith.constant 0 : index
    %60 = vector.load %arg3[%c0_9, %c0_10] : memref<8x1xf32, #tpu.memory_space<vmem>>, vector<8x1xf32>
    tpu.vector_store %arg3[%c0_9, %c0_10], %59 {strides = array<i32>} : memref<8x1xf32, #tpu.memory_space<vmem>>, vector<8x1xf32>,
    return
  }
  func.func @transform_0(%arg0: i32, %arg1: memref<8xi32, #tpu.memory_space<smem>>) -> (i32, i32) {
    %c0_i32 = arith.constant 0 : i32
    %c0_i32_0 = arith.constant 0 : i32
    %c0_i32_1 = arith.constant 0 : i32
    return %c0_i32, %c0_i32_0 : i32, i32
  }
  func.func @transform_1(%arg0: i32, %arg1: memref<8xi32, #tpu.memory_space<smem>>) -> (i32, i32) {
    %c0_i32 = arith.constant 0 : i32
    %c0_i32_0 = arith.constant 0 : i32
    %c0_i32_1 = arith.constant 0 : i32
    return %c0_i32, %c0_i32_0 : i32, i32
  }
}

</mosaic_0001>

<bundles_post_ra>
// kernel: tpu_custom_call.1
= control target key start
LH: loop header
LB: loop body
LE: loop exit
PB: predicated region body
PF: predicated region fallthrough
CT: control target
= control target key end

     0   :  { %s190_s12 = smov [#allocation3]   ;;  %s301_s0 = inlined_call_operand.vmem [shape: s32[8], index: 0, kind: input, shape index: {}]   ;;  %s302_s1 = inlined_call_operand.vmem [shape: f32[163,32], index: 1, kind: input, shape index: {}]   ;;  %s303_s2 = inlined_call_operand.vmem [shape: f32[8,1], index: 2, kind: output, shape index: {}]  }
   0x1   :  { %s8_s11 = sshll.u32 %s301_s0, 4  ;;  %s9_s11 = int_to_ptr.vmem [resolvable:$true] %s8_s11 }
   0x2   :  { %11 = dma.vmem_to_smem %s9_s11, 16, %s190_s12, [#allocation2] }
   0x3   :  { %188 = dma.done.wait [#allocation2], 16 }
   0x4   :  { %189 = vsyncadd [#allocation2], 4294967280 }
   0x5   :  { %14 = sfence }
   0x6   :  { %v88_v0 = vld [vmem:[%s302_s1 + $0x78] sm:$0xff]  ;;  %v87_v1 = vld [vmem:[%s302_s1 + $0x70] sm:$0xff]  ;;  %v17_v2 = vlaneseq  ;;  %s19_s17 = sld [smem:[#allocation3]]  ;;  %v86_v3 = vld [vmem:[%s302_s1 + $0x68] sm:$0xff]  ;;  %v191_v12 = vmov 0.0   ;;  %vm59_vm2 = vcmask 1040384  }
   0x7   :  { %89 = vmatpush.msra.mxu0 %v88_v0  ;;  %s156_s18 = sld [smem:[#allocation3 + $0x1]]  ;;  %v85_v5 = vld [vmem:[%s302_s1 + $0x60] sm:$0xff]  ;;  %v84_v6 = vld [vmem:[%s302_s1 + $0x58] sm:$0xff]  ;;  %v111_v9 = vld [vmem:[%s302_s1 + $0x90] sm:$0xff]  ;;  %vm61_vm4 = vcmask 1041408   ;;  %vm63_vm6 = vcmask 1042432  }
   0x8   :  { %s158_s20 = sld [smem:[#allocation3 + $0x2]]  ;;  %v219_v4 = vand.u32 127, %v17_v2  ;;  %v112_v8 = vld [vmem:[%s302_s1 + $0x98] sm:$0xff]  ;;  %v83_v11 = vld [vmem:[%s302_s1 + $0x50] sm:$0xff]  ;;  %v110_v15 = vld [vmem:[%s302_s1 + $0x88] sm:$0xff]  ;;  %vm65_vm8 = vcmask 1043456  }
   0x9   :  { %90 = vmatpush.msra.mxu0 %v87_v1  ;;  %s160_s21 = sld [smem:[#allocation3 + $0x3]]  ;;  %131 = vmatpush.msra.mxu1 %v112_v8  ;;  %v82_v18 = vld [vmem:[%s302_s1 + $0x48] sm:$0xff]  ;;  %v81_v22 = vld [vmem:[%s302_s1 + $0x40] sm:$0xff]  ;;  %v80_v23 = vld [vmem:[%s302_s1 + $0x38] sm:$0xff]  ;;  %vm67_vm10 = vcmask 1044480   ;;  %vm69_vm13 = vcmask 1045504  }
   0xa   :  { %s224_s24 = sld [smem:[#allocation3 + $0x4]]  ;;  %v79_v27 = vld [vmem:[%s302_s1 + $0x30] sm:$0xff]  ;;  %v78_v31 = vld [vmem:[%s302_s1 + $0x28] sm:$0xff]  ;;  %v77_v32 = vld [vmem:[%s302_s1 + $0x20] sm:$0xff]  ;;  %vm71_vm14 = vcmask 1046528   ;;  %vm115_vm15 = vcmask 261120  }
   0xb   :  { %91 = vmatpush.msra.mxu0 %v86_v3  ;;  %s229_s27 = sld [smem:[#allocation3 + $0x5]]  ;;  %132 = vmatpush.msra.mxu1 %v111_v9  ;;  %v76_v36 = vld [vmem:[%s302_s1 + $0x18] sm:$0xff]  ;;  %v75_v39 = vld [vmem:[%s302_s1 + $0x10] sm:$0xff]  ;;  %v74_v40 = vld [vmem:[%s302_s1 + $0x8] sm:$0xff] }
   0xc   :  { %v20_v7 = vstv %s19_s17  ;;  %s246_s8 = sld [smem:[#allocation3 + $0x6]]  ;;  %v73_v43 = vld [vmem:[%s302_s1] sm:$0xff] }
   0xd   :  { %92 = vmatpush.msra.mxu0 %v85_v5  ;;  %vm21_vm0 = vcmp.eq.s32.totalorder %v219_v4, %v20_v7  ;;  %v25_v10 = vstv %s156_s18  ;;  %133 = vmatpush.msra.mxu1 %v110_v15  ;;  %s168_s13 = sld [smem:[#allocation3 + $0x7]]  ;;  %v109_v45 = vld [vmem:[%s302_s1 + $0x80] sm:$0xff] }
   0xe   :  { %v155_v13 = vsel %vm21_vm0, 1.0, %v191_v12  ;;  %vm26_vm1 = vcmp.eq.s32.totalorder %v219_v4, %v25_v10  ;;  %v30_v14 = vstv %s158_s20  ;;  %v173_v47 = vld [vmem:[%s302_s1 + $0xa0] ss:$0 sm:$0xff]  ;;  %v174_v50 = vld [vmem:[%s302_s1 + $0xa1] ss:$0 sm:$0xff]  ;;  %vm149_vm0 = vcmask 7168  }
   0xf   :  { %93 = vmatpush.msra.mxu0 %v84_v6  ;;  %v157_v16 = vsel %vm26_vm1, 1.0, %v191_v12  ;;  %vm31_vm3 = vcmp.eq.s32.totalorder %v219_v4, %v30_v14  ;;  %v35_v17 = vstv %s160_s21  ;;  %134 = vmatpush.msra.mxu1 %v109_v45  ;;  %v175_v54 = vld [vmem:[%s302_s1 + $0xa2] ss:$0 sm:$0xff] }
  0x10   :  { %v159_v19 = vsel %vm31_vm3, 1.0, %v191_v12  ;;  %vm36_vm5 = vcmp.eq.s32.totalorder %v219_v4, %v35_v17  ;;  %v40_v20 = vstv %s224_s24  ;;  %v60_v21 = vsel %vm59_vm2, %v155_v13, %v157_v16 }
  0x11   :  { %94 = vmatpush.msra.mxu0 %v83_v11  ;;  %v161_v24 = vsel %vm36_vm5, 1.0, %v191_v12  ;;  %vm41_vm7 = vcmp.eq.s32.totalorder %v219_v4, %v40_v20  ;;  %v45_v25 = vstv %s229_s27  ;;  %v62_v26 = vsel %vm61_vm4, %v60_v21, %v159_v19 }
  0x12   :  { %v163_v28 = vsel %vm41_vm7, 1.0, %v191_v12  ;;  %vm46_vm9 = vcmp.eq.s32.totalorder %v219_v4, %v45_v25  ;;  %v50_v29 = vstv %s246_s8  ;;  %v64_v30 = vsel %vm63_vm6, %v62_v26, %v161_v24 }
  0x13   :  { %95 = vmatpush.msra.mxu0 %v82_v18  ;;  %v165_v33 = vsel %vm46_vm9, 1.0, %v191_v12  ;;  %vm51_vm11 = vcmp.eq.s32.totalorder %v219_v4, %v50_v29  ;;  %v55_v34 = vstv %s168_s13  ;;  %v66_v35 = vsel %vm65_vm8, %v64_v30, %v163_v28 }
  0x14   :  { %v167_v37 = vsel %vm51_vm11, 1.0, %v191_v12  ;;  %vm56_vm12 = vcmp.eq.s32.totalorder %v219_v4, %v55_v34  ;;  %v68_v38 = vsel %vm67_vm10, %v66_v35, %v165_v33 }
  0x15   :  { %96 = vmatpush.msra.mxu0 %v81_v22  ;;  %v169_v41 = vsel %vm56_vm12, 1.0, %v191_v12  ;;  %v70_v42 = vsel %vm69_vm13, %v68_v38, %v167_v37 }
  0x16   :  { %v72_v44 = vsel %vm71_vm14, %v70_v42, %v169_v41 }
  0x17   :  { %97 = vmatpush.msra.mxu0 %v80_v23 }
  0x19   :  { %98 = vmatpush.msra.mxu0 %v79_v27 }
  0x1b   :  { %99 = vmatpush.msra.mxu0 %v78_v31 }
  0x1d   :  { %100 = vmatpush.msra.mxu0 %v77_v32 }
  0x1f   :  { %101 = vmatpush.msra.mxu0 %v76_v36 }
  0x21   :  { %102 = vmatpush.msra.mxu0 %v75_v39 }
  0x23   :  { %103 = vmatpush.msra.mxu0 %v74_v40 }
  0x25   :  { %104 = vmatpush.msra.mxu0 %v73_v43 }
  0x26   :  { %105 = vmatmul.f32.vlgmr.msra.gmra.mxu0 %v72_v44 }
  0xa3   :  { %v106_v46 = vpop.f32.mrf.mxu0 }
  0xa4   :  { %170 = vmatmul.msk.f32.vlgmr.msra.gmra.mxu1 %vm115_vm15, %v106_v46 }
 0x121   :  { %v136_v48 = vpop.f32.mrf.mxu1 }
 0x122   :  { %v137_v49 = vadd.f32 %v173_v47, %v136_v48 }
 0x124   :  { %v139_v51 = vmax.f32 %v137_v49, 0.0 }
 0x126   :  { %v143_v52 = vmul.f32 %v174_v50, %v139_v51 }
 0x128   :  { %v144_v53 = vsel %vm115_vm15, %v143_v52, 0.0 }
 0x129   :  { %145 = vadd.xlane.f32.xlu0 %v144_v53 }
 0x19c   :  { %v146_v55 = vpop.xlane.xlu0 %145 }
 0x19d   :  { %v148_v56 = vadd.f32 %v175_v54, %v146_v55 }
 0x19f   :  { %150 = vst.msk [vmem:[%s303_s2] sm:$0xff] %vm149_vm0, %v148_v56 }

</bundles_post_ra>
